<compile_context>
chip_gen: v7x
topology: tpu7x:2x2x1
jax: 0.10.0
libtpu: 0.0.40
codegen_flags: <defaults>
</compile_context>

<pallas_src>
import jax
import jax.numpy as jnp
from jax.experimental import pallas as pl
from jax.experimental.pallas import tpu as pltpu


def _cdiv(a, b):
    return (a + b - 1) // b


# --------------------------------------------------------------------------- #
# Kernel
# --------------------------------------------------------------------------- #
def channel_attn_kernel(x_ref, w_ref, b_ref, out_ref):
    """One (C, TN) lane tile: out = relu(w' @ x + b') + x."""
    x = x_ref[...]                                           # (C, TN), f32 or bf16
    # 1x1 conv over channels == MXU matmul; bf16 operands, f32 accumulation.
    y = jnp.dot(w_ref[...], x.astype(jnp.bfloat16),
                preferred_element_type=jnp.float32)          # (C, TN) f32
    y = jnp.maximum(y + b_ref[...], 0.0)                     # folded BN bias + ReLU (f32)
    # Residual add in f32; lane-dense store in the output dtype.
    out_ref[...] = (y + x.astype(jnp.float32)).astype(out_ref.dtype)


# --------------------------------------------------------------------------- #
# Parameter construction (synthetic conv(1x1) + BatchNorm(eval), BN folded)
# --------------------------------------------------------------------------- #
def make_conv_bn_params(key, cin, cout, eps=1e-5):
    """Deterministic synthetic conv(1x1)+BatchNorm(eval) params, folded to scale/bias."""
    k_w, k_b, k_g, k_be, k_m, k_v = jax.random.split(key, 6)
    w = jax.random.normal(k_w, (cout, cin), jnp.float32) * 0.1
    conv_b = jax.random.normal(k_b, (cout,), jnp.float32) * 0.1
    gamma = 1.0 + 0.1 * jax.random.normal(k_g, (cout,), jnp.float32)
    beta = 0.1 * jax.random.normal(k_be, (cout,), jnp.float32)
    r_mean = 0.1 * jax.random.normal(k_m, (cout,), jnp.float32)
    r_var = jnp.abs(jax.random.normal(k_v, (cout,), jnp.float32)) + 0.5
    scale = gamma / jnp.sqrt(r_var + eps)
    bias = (conv_b - r_mean) * scale + beta
    return w, scale.reshape(cout, 1), bias.reshape(cout, 1)


# --------------------------------------------------------------------------- #
# Tiling / VMEM helpers
# --------------------------------------------------------------------------- #
def _vmem_capacity_bytes():
    """Physical VMEM per TensorCore (v5e/v6e: 128 MiB, v7x: 64 MiB)."""
    try:
        return int(pltpu.get_tpu_info().vmem_capacity_bytes)
    except Exception:
        return 64 * 1024 * 1024      # conservative default (v7x per-TC)


def _vmem_footprint(c, tn, x_bytes, out_bytes, x_buffers):
    """Per-step VMEM bytes, padded to (8,128) tiles."""
    sub = _cdiv(c, 8) * 8
    lane = _cdiv(tn, 128) * 128
    x_tile = sub * lane * x_bytes
    o_tile = sub * lane * out_bytes
    w_tile = sub * (_cdiv(c, 128) * 128) * 2        # bf16 weight, single-buffered
    b_tile = sub * 128 * 4                          # f32 bias, one lane tile
    return x_buffers * x_tile + 2 * o_tile + w_tile + b_tile


def _pick_lane_tile(n, c, b, max_lane_tile):
    """Lane (H*W) tile: full extent for small N, else a multiple of 128.

    HBM-bound kernel -> as big as reasonable (amortizes ~0.35us/step overhead),
    while guaranteeing >= 2 total grid steps so both v7x TensorCores get work.
    """
    cap = max_lane_tile
    if c <= 512:                       # small-C shapes: per-step bytes are tiny, go bigger
        cap = max(cap, 2048)
    cap = max(128, cap - cap % 128)

    tn = n if n <= cap else cap        # n <= cap: full extent is a legal block shape
    # Megacore occupancy: B * ceil(N/tn) >= 2 whenever N allows it.
    if b * _cdiv(n, tn) < 2 and n > 128:
        tn = min(tn, _cdiv(_cdiv(n, 2), 128) * 128)
    return tn


def _spec(shape, index_map, buffer_count=None):
    """BlockSpec with an optional pipelining-depth hint (pl.Buffered).

    Falls back to a plain BlockSpec if this JAX version does not accept the
    pipeline_mode kwarg (keeps the kernel runnable across versions)."""
    if buffer_count is not None:
        try:
            return pl.BlockSpec(shape, index_map,
                                pipeline_mode=pl.Buffered(buffer_count))
        except TypeError:
            pass
    return pl.BlockSpec(shape, index_map)


# --------------------------------------------------------------------------- #
# Wrapper
# --------------------------------------------------------------------------- #
def _channel_attn_impl(x_nchw, wa, sa, ba, *, max_lane_tile=1024,
                       x_dtype=jnp.float32, out_dtype=jnp.float32,
                       buffer_hints=True):
    B, C, H, W = x_nchw.shape
    N = H * W
    assert N == C, "Channel_Attn requires N == W*H == C"
    assert wa.shape == (C, N)

    x = x_nchw.reshape(B, C, N).astype(x_dtype)

    # Fold the eval-mode BatchNorm scale into the 1x1-conv weight (w' = s*w);
    # bf16 weight halves its DMA bytes and runs the matmul at bf16 MXU rate
    # (f32 accumulation via preferred_element_type).  Bias stays f32.
    w_folded = (wa * sa).astype(jnp.bfloat16)                # (C, C)
    bias = ba.astype(jnp.float32)                            # (C, 1)

    x_bytes = jnp.dtype(x_dtype).itemsize
    out_bytes = jnp.dtype(out_dtype).itemsize

    # Lane tiling sized against the per-generation VMEM budget.
    capacity = _vmem_capacity_bytes()
    budget = max(capacity - 8 * 1024 * 1024, 16 * 1024 * 1024)  # headroom for internal scratch
    tn = _pick_lane_tile(N, C, B, max_lane_tile)
    while _vmem_footprint(C, tn, x_bytes, out_bytes, 2) > budget and tn > 128:
        nxt = _cdiv(tn // 2, 128) * 128
        if nxt >= tn:
            break
        tn = nxt

    lane_steps = _cdiv(N, tn)
    grid = (B, lane_steps)

    # Deeper x pipelining when the per-step tile is small relative to the fixed
    # per-step overhead (matters most on v7x's 3.2 TB/s HBM).
    x_buffers = 3 if (C * tn * x_bytes <= (1 << 20) and B * lane_steps >= 3) else 2
    x_hint = x_buffers if (buffer_hints and x_buffers != 2) else None
    wb_hint = 1 if buffer_hints else None   # constant index_map -> single buffer

    footprint = _vmem_footprint(C, tn, x_bytes, out_bytes, x_buffers)
    vmem_limit = int(min(max(2 * footprint, 32 * 1024 * 1024), budget))

    cost = pl.CostEstimate(
        flops=2 * B * C * C * N,
        transcendentals=0,
        bytes_accessed=B * C * N * (x_bytes + out_bytes) + C * C * 2 + C * 4,
    )

    out = pl.pallas_call(
        channel_attn_kernel,
        out_shape=jax.ShapeDtypeStruct((B, C, N), out_dtype),
        grid_spec=pltpu.PrefetchScalarGridSpec(
            num_scalar_prefetch=0,
            grid=grid,
            in_specs=[
                # x tile: batch dim squeezed -> kernel sees a (C, tn) view.
                _spec((None, C, tn), lambda b, j: (b, 0, j), x_hint),
                # Folded weight / bias: constant index_map, VMEM-resident,
                # single-buffered (no dead 2x copy; matters for large C on v7x).
                _spec((C, C), lambda b, j: (0, 0), wb_hint),
                _spec((C, 1), lambda b, j: (0, 0), wb_hint),
            ],
            out_specs=_spec((None, C, tn), lambda b, j: (b, 0, j)),
        ),
        compiler_params=pltpu.CompilerParams(
            dimension_semantics=("parallel", "parallel"),
            vmem_limit_bytes=vmem_limit,
        ),
        cost_estimate=cost,
    )(x, w_folded, bias)

    return out.reshape(B, C, H, W)


def channel_attn(x_nchw, wa, sa, ba, **kwargs):
    """Fused relu(bn(attn_conv(x))) + x  (the value the PyTorch forward returns)."""
    try:
        return _channel_attn_impl(x_nchw, wa, sa, ba, buffer_hints=True, **kwargs)
    except Exception:
        # Compatibility fallback: identical kernel/tiling, just without the
        # pl.Buffered pipelining hints (older JAX versions / unsupported combos).
        return _channel_attn_impl(x_nchw, wa, sa, ba, buffer_hints=False, **kwargs)


# --------------------------------------------------------------------------- #
# References
# --------------------------------------------------------------------------- #
def channel_attn_reference(x_nchw, wa, sa, ba, *, x_dtype=jnp.float32,
                           out_dtype=jnp.float32):
    """Pure-JAX reference mirroring the kernel numerics (bf16 matmul operands,
    f32 accumulation/bias/ReLU/residual, optional bf16 I/O)."""
    B, C, H, W = x_nchw.shape
    N = H * W
    x = x_nchw.reshape(B, C, N).astype(x_dtype)
    w = (wa * sa).astype(jnp.bfloat16)
    y = jnp.einsum("oc,bcn->bon", w, x.astype(jnp.bfloat16),
                   preferred_element_type=jnp.float32)
    y = jnp.maximum(y + ba[None].astype(jnp.float32), 0.0)
    return (y + x.astype(jnp.float32)).astype(out_dtype).reshape(B, C, H, W)


def channel_attn_reference_f32(x_nchw, wa, sa, ba):
    """Full-f32 reference of the original PyTorch numerics (no bf16 rounding)."""
    B, C, H, W = x_nchw.shape
    N = H * W
    x = x_nchw.reshape(B, C, N).astype(jnp.float32)
    y = jnp.einsum("oc,bcn->bon", wa * sa, x)
    y = jnp.maximum(y + ba[None], 0.0)
    return (y + x).reshape(B, C, H, W)


# --------------------------------------------------------------------------- #
# Test
# --------------------------------------------------------------------------- #
if __name__ == "__main__":
    key = jax.random.PRNGKey(0)

    def run_case(B, C, H, W, case_key, x_dtype=jnp.float32, out_dtype=jnp.float32):
        N = H * W
        kx, ka = jax.random.split(case_key)
        x = jax.random.normal(kx, (B, C, H, W), jnp.float32)
        # attn_conv: N -> C channels (`dim` in the reference __init__ is a typo for in_dim).
        wa, sa, ba = make_conv_bn_params(ka, N, C)

        out = jax.block_until_ready(
            channel_attn(x, wa, sa, ba, x_dtype=x_dtype, out_dtype=out_dtype))
        assert out.shape == (B, C, H, W) and out.dtype == jnp.dtype(out_dtype)

        # Check against a reference with identical numerics.
        ref = channel_attn_reference(x, wa, sa, ba, x_dtype=x_dtype, out_dtype=out_dtype)
        tol = 1e-3 if out_dtype == jnp.float32 else 2e-2
        assert jnp.allclose(out.astype(jnp.float32), ref.astype(jnp.float32),
                            atol=tol, rtol=tol), f"kernel/ref mismatch at {(B, C, H, W)}"

        # Drift check vs the true-f32 PyTorch conv+BN numerics (bf16 rounding of
        # the weight/activations is the only difference).
        ref32 = channel_attn_reference_f32(x, wa, sa, ba)
        ftol = 5e-2 if (x_dtype == jnp.float32 and out_dtype == jnp.float32) else 1e-1
        assert jnp.allclose(out.astype(jnp.float32), ref32, atol=ftol, rtol=ftol), \
            f"drift vs f32 reference at {(B, C, H, W)}"

    # Lane-dense shape (N = H*W = C = 128), grid = (2, 1).
    run_case(2, 128, 16, 8, jax.random.fold_in(key, 0))
    # Tiny toy shape (N = C = 16); full-extent blocks.
    run_case(2, 16, 4, 4, jax.random.fold_in(key, 1))
    # B == 1: lane axis is split so both v7x TensorCores get work (grid = (1, 2)).
    run_case(1, 256, 16, 16, jax.random.fold_in(key, 2))
    # bf16 I/O variant (halves HBM bytes moved on this bandwidth-bound kernel).
    run_case(2, 128, 16, 8, jax.random.fold_in(key, 3),
             x_dtype=jnp.bfloat16, out_dtype=jnp.bfloat16)

    print("KERNEL_OK")
</pallas_src>

<mosaic_0001>
module attributes {stable_mosaic.version = 11 : i64} {
  func.func @channel_attn_kernel(%arg0: i32, %arg1: i32, %arg2: memref<1x128x128xf32, #tpu.memory_space<vmem>>, %arg3: memref<128x128xbf16, #tpu.memory_space<vmem>>, %arg4: memref<128x1xf32, #tpu.memory_space<vmem>>, %arg5: memref<1x128x128xf32, #tpu.memory_space<vmem>>) attributes {dimension_semantics = [#tpu.dimension_semantics<parallel>, #tpu.dimension_semantics<parallel>], iteration_bounds = array<i64: 2, 1>, scalar_prefetch = 0 : i64, scratch_operands = 0 : i64, tpu.core_type = #tpu.core_type<tc>, window_params = [{transform_indices = @transform_0, window_bounds = array<i64: 1, 128, 128>}, {pipeline_mode = #tpu.pipeline_mode<synchronous>, transform_indices = @transform_1, window_bounds = array<i64: 128, 128>}, {pipeline_mode = #tpu.pipeline_mode<synchronous>, transform_indices = @transform_2, window_bounds = array<i64: 128, 1>}, {transform_indices = @transform_3, window_bounds = array<i64: 1, 128, 128>}]} {
    %c0 = arith.constant 0 : index
    %c0_0 = arith.constant 0 : index
    %c0_1 = arith.constant 0 : index
    %0 = vector.load %arg2[%c0, %c0_0, %c0_1] : memref<1x128x128xf32, #tpu.memory_space<vmem>>, vector<1x128x128xf32>
    %1 = vector.shape_cast %0 : vector<1x128x128xf32> to vector<128x128xf32>
    %c0_2 = arith.constant 0 : index
    %c0_3 = arith.constant 0 : index
    %2 = vector.load %arg3[%c0_2, %c0_3] : memref<128x128xbf16, #tpu.memory_space<vmem>>, vector<128x128xbf16>
    %3 = arith.truncf %1 : vector<128x128xf32> to vector<128x128xbf16>
    %cst = arith.constant dense<0.000000e+00> : vector<128x128xf32>
    %4 = tpu.matmul %2, %3, %cst {dimension_numbers = #tpu.dot_dimension_numbers<[1], [0], [0], [1], [0, 0, 1, 1], [], []>} : vector<128x128xbf16>, vector<128x128xbf16>, vector<128x128xf32> -> vector<128x128xf32>
    %c0_4 = arith.constant 0 : index
    %c0_5 = arith.constant 0 : index
    %5 = vector.load %arg4[%c0_4, %c0_5] : memref<128x1xf32, #tpu.memory_space<vmem>>, vector<128x1xf32>
    %6 = vector.broadcast %5 : vector<128x1xf32> to vector<128x128xf32>
    %7 = arith.addf %4, %6 : vector<128x128xf32>
    %cst_6 = arith.constant 0.000000e+00 : f32
    %8 = vector.broadcast %cst_6 : f32 to vector<128x128xf32>
    %9 = arith.maximumf %7, %8 : vector<128x128xf32>
    %10 = arith.addf %9, %1 : vector<128x128xf32>
    %c0_7 = arith.constant 0 : index
    %c0_8 = arith.constant 0 : index
    %c0_9 = arith.constant 0 : index
    %11 = vector.load %arg5[%c0_7, %c0_8, %c0_9] : memref<1x128x128xf32, #tpu.memory_space<vmem>>, vector<1x128x128xf32>
    %12 = vector.shape_cast %11 : vector<1x128x128xf32> to vector<128x128xf32>
    %13 = vector.shape_cast %10 : vector<128x128xf32> to vector<1x128x128xf32>
    tpu.vector_store %arg5[%c0_7, %c0_8, %c0_9], %13 {strides = array<i32>} : memref<1x128x128xf32, #tpu.memory_space<vmem>>, vector<1x128x128xf32>,
    return
  }
  func.func @transform_0(%arg0: i32, %arg1: i32) -> (i32, i32, i32) {
    %c0_i32 = arith.constant 0 : i32
    %c0_i32_0 = arith.constant 0 : i32
    return %arg0, %c0_i32, %arg1 : i32, i32, i32
  }
  func.func @transform_1(%arg0: i32, %arg1: i32) -> (i32, i32) {
    %c0_i32 = arith.constant 0 : i32
    %c0_i32_0 = arith.constant 0 : i32
    %c0_i32_1 = arith.constant 0 : i32
    return %c0_i32, %c0_i32_0 : i32, i32
  }
  func.func @transform_2(%arg0: i32, %arg1: i32) -> (i32, i32) {
    %c0_i32 = arith.constant 0 : i32
    %c0_i32_0 = arith.constant 0 : i32
    %c0_i32_1 = arith.constant 0 : i32
    return %c0_i32, %c0_i32_0 : i32, i32
  }
  func.func @transform_3(%arg0: i32, %arg1: i32) -> (i32, i32, i32) {
    %c0_i32 = arith.constant 0 : i32
    %c0_i32_0 = arith.constant 0 : i32
    return %arg0, %c0_i32, %arg1 : i32, i32, i32
  }
}

module attributes {stable_mosaic.version = 11 : i64} {
  func.func @channel_attn_kernel(%arg0: i32, %arg1: i32, %arg2: memref<1x128x128xf32, #tpu.memory_space<vmem>>, %arg3: memref<128x128xbf16, #tpu.memory_space<vmem>>, %arg4: memref<128x1xf32, #tpu.memory_space<vmem>>, %arg5: memref<1x128x128xf32, #tpu.memory_space<vmem>>) attributes {dimension_semantics = [#tpu.dimension_semantics<parallel>, #tpu.dimension_semantics<parallel>], iteration_bounds = array<i64: 2, 1>, scalar_prefetch = 0 : i64, scratch_operands = 0 : i64, tpu.core_type = #tpu.core_type<tc>, window_params = [{transform_indices = @transform_0, window_bounds = array<i64: 1, 128, 128>}, {pipeline_mode = #tpu.pipeline_mode<synchronous>, transform_indices = @transform_1, window_bounds = array<i64: 128, 128>}, {pipeline_mode = #tpu.pipeline_mode<synchronous>, transform_indices = @transform_2, window_bounds = array<i64: 128, 1>}, {transform_indices = @transform_3, window_bounds = array<i64: 1, 128, 128>}]} {
    %c0 = arith.constant 0 : index
    %c0_0 = arith.constant 0 : index
    %c0_1 = arith.constant 0 : index
    %0 = vector.load %arg2[%c0, %c0_0, %c0_1] : memref<1x128x128xf32, #tpu.memory_space<vmem>>, vector<1x128x128xf32>
    %1 = vector.shape_cast %0 : vector<1x128x128xf32> to vector<128x128xf32>
    %c0_2 = arith.constant 0 : index
    %c0_3 = arith.constant 0 : index
    %2 = vector.load %arg3[%c0_2, %c0_3] : memref<128x128xbf16, #tpu.memory_space<vmem>>, vector<128x128xbf16>
    %3 = arith.truncf %1 : vector<128x128xf32> to vector<128x128xbf16>
    %cst = arith.constant dense<0.000000e+00> : vector<128x128xf32>
    %4 = tpu.matmul %2, %3, %cst {dimension_numbers = #tpu.dot_dimension_numbers<[1], [0], [0], [1], [0, 0, 1, 1], [], []>} : vector<128x128xbf16>, vector<128x128xbf16>, vector<128x128xf32> -> vector<128x128xf32>
    %c0_4 = arith.constant 0 : index
    %c0_5 = arith.constant 0 : index
    %5 = vector.load %arg4[%c0_4, %c0_5] : memref<128x1xf32, #tpu.memory_space<vmem>>, vector<128x1xf32>
    %6 = vector.broadcast %5 : vector<128x1xf32> to vector<128x128xf32>
    %7 = arith.addf %4, %6 : vector<128x128xf32>
    %cst_6 = arith.constant 0.000000e+00 : f32
    %8 = vector.broadcast %cst_6 : f32 to vector<128x128xf32>
    %9 = arith.maximumf %7, %8 : vector<128x128xf32>
    %10 = arith.addf %9, %1 : vector<128x128xf32>
    %c0_7 = arith.constant 0 : index
    %c0_8 = arith.constant 0 : index
    %c0_9 = arith.constant 0 : index
    %11 = vector.load %arg5[%c0_7, %c0_8, %c0_9] : memref<1x128x128xf32, #tpu.memory_space<vmem>>, vector<1x128x128xf32>
    %12 = vector.shape_cast %11 : vector<1x128x128xf32> to vector<128x128xf32>
    %13 = vector.shape_cast %10 : vector<128x128xf32> to vector<1x128x128xf32>
    tpu.vector_store %arg5[%c0_7, %c0_8, %c0_9], %13 {strides = array<i32>} : memref<1x128x128xf32, #tpu.memory_space<vmem>>, vector<1x128x128xf32>,
    return
  }
  func.func @transform_0(%arg0: i32, %arg1: i32) -> (i32, i32, i32) {
    %c0_i32 = arith.constant 0 : i32
    %c0_i32_0 = arith.constant 0 : i32
    return %arg0, %c0_i32, %arg1 : i32, i32, i32
  }
  func.func @transform_1(%arg0: i32, %arg1: i32) -> (i32, i32) {
    %c0_i32 = arith.constant 0 : i32
    %c0_i32_0 = arith.constant 0 : i32
    %c0_i32_1 = arith.constant 0 : i32
    return %c0_i32, %c0_i32_0 : i32, i32
  }
  func.func @transform_2(%arg0: i32, %arg1: i32) -> (i32, i32) {
    %c0_i32 = arith.constant 0 : i32
    %c0_i32_0 = arith.constant 0 : i32
    %c0_i32_1 = arith.constant 0 : i32
    return %c0_i32, %c0_i32_0 : i32, i32
  }
  func.func @transform_3(%arg0: i32, %arg1: i32) -> (i32, i32, i32) {
    %c0_i32 = arith.constant 0 : i32
    %c0_i32_0 = arith.constant 0 : i32
    return %arg0, %c0_i32, %arg1 : i32, i32, i32
  }
}

</mosaic_0001>

<bundles_post_ra>
// kernel: tpu_custom_call.1
= control target key start
LH: loop header
LB: loop body
LE: loop exit
PB: predicated region body
PF: predicated region fallthrough
CT: control target
= control target key end

     0   :  { %8 = vsyncpa [#allocation3], 0  ;;  %s1304_s0 = inlined_call_operand.hbm [shape: f32[2,128,128], index: 0, kind: input, shape index: {}]   ;;  %s1305_s1 = inlined_call_operand.vmem [shape: bf16[128,128], index: 1, kind: input, shape index: {}]   ;;  %s1306_s2 = inlined_call_operand.vmem [shape: f32[128,1], index: 2, kind: input, shape index: {}]   ;;  %s1307_s3 = inlined_call_operand.hbm [shape: f32[2,128,128], index: 3, kind: output, shape index: {}]  }
   0x1   :  { %10 = vsyncpa [#allocation3 + $0x1], 0 }
   0x2   :  { %11 = vsyncpa [#allocation4], 0 }
   0x3   :  { %13 = vsyncpa [#allocation4 + $0x1], 0  ;;  %s943_s12 = smov 0   ;;  %s945_s13 = smov 0  }
   0x4   :  { %s947_s14 = smov 0   ;;  %s949_s15 = smov 0  }
   0x5   :  { %s951_s16 = smov 0   ;;  %s953_s17 = smov 0  }
   0x6 LB: > { %s636_s18 = sadd.s32 4294967295, %s914_s17   ;;  %s637_s19 = sadd.s32 4294967294, %s914_s17   ;;  %s914_s17 = sphi %s953_s17, %s19_s17   ;;  %s910_s16 = sphi %s951_s16, %s1322_s16   ;;  %s906_s15 = sphi %s949_s15, %s1321_s15   ;;  %s902_s14 = sphi %s947_s14, %s1320_s14   ;;  %s898_s13 = sphi %s945_s13, %s1319_s13   ;;  %s894_s12 = sphi %s943_s12, %s1318_s12  }
   0x7   : > { %s31_s20 = sadd.s32 1, %s910_s16  ;;  %s40_s21 = sadd.s32 1, %s902_s14 }
   0x8   : > { %p33_p0 = scmp.ge.s32.totalorder %s31_s20, 2  ;;  %p47_p1 = scmp.ne.s32.totalorder %s902_s14, %s898_s13 }
   0x9   : > { %p48_p2 = scmp.eq.s32.totalorder %s914_s17, 0  ;;  %p53_p3 = scmp.ne.s32.totalorder %s898_s13, %s894_s12 }
   0xa   : > { %s1324_s20 = smov (%p33_p0, %s31_s20), 0  ;;  %p54_p5 = scmp.eq.s32.totalorder %s636_s18, 0 }
   0xb   : > { %p984_p4 = por %p48_p2, %p47_p1  ;;  %s35_s23 = ssub.s32 %s910_s16, %s1324_s20 }
   0xc   : > { %p121_p6 = scmp.eq.s32.totalorder %s636_s18, 1  ;;  %p38_p7 = scmp.eq.s32.totalorder %s35_s23, 0 }
   0xd   : > { %p990_p8 = por %p54_p5, %p53_p3  ;;  %p127_p10 = scmp.eq.s32.totalorder %s637_s19, 1 }
   0xe   : > { %p994_p9 = por %p121_p6, %p47_p1  ;;  %p737_p13 = scmp.lt.s32.totalorder %s914_s17, 2 }
   0xf   : > { %s999_s26 = scalar_select %p38_p7, %s902_s14, %s40_s21  }
  0x10   : > { %s1311_s25 = scalar_select %p994_p9, 1, 0 }
  0x11   : > { %p1001_p11 = por %p127_p10, %p53_p3  ;;  %s153_s28 = sand.u32 1, %s902_s14  }
  0x12   : > { %s640_s29 = sshll.u32 %s153_s28, 7  ;;  %s659_s30 = sshll.u32 %s910_s16, 11 }
  0x13   : > { %s1312_s27 = scalar_select %p1001_p11, 1, 0 }
  0x14   : > { %s1012_s6 = scalar_lea.hbm %s1304_s0, %s659_s30  ;;  %s157_s7 = scalar_lea.vmem [#allocation2], %s640_s29 }
  0x15   : > { %s165_s8 = sshll.u32 %s157_s7, 4  ;;  %p1018_p0 = pnand %p737_p13, %p984_p4  ;;  %s1014_s8 = int_to_ptr.vmem [resolvable:$true] %s165_s8 }
  0x16   : > { %s1023_s10 = scalar_lea.sflag [#allocation3], %s153_s28  ;;  %s802_s11 = scalar_lea.hbm %s1012_s6, 2048 }
  0x17   : > { %p803_p2 = scmp.ne.s32.totalorder %s1012_s6, %s802_s11  ;;  %p804_p3 = pneg %p1018_p0 }
  0x18   : > { %s807_s21 = scalar_lea.hbm %s1304_s0, 4096  ;;  %p808_p4 = scmp.lt.u32.totalorder %s1012_s6, %s1304_s0 }
  0x19   : > { %p805_p5 = pnand %p804_p3, %p803_p2  ;;  %p809_p7 = scmp.lt.u32.totalorder %s807_s21, %s802_s11 }
  0x1a   : > { %p811_p13 = scmp.lt.u32.totalorder %s802_s11, %s1012_s6 }
  0x1b   : > { %p806_p6 = pneg %p805_p5  ;;  %p810_p10 = por %p809_p7, %p808_p4 }
  0x1d   : > { %p812_p12 = por %p811_p13, %p810_p10 }
  0x1f   : > { %p813_p1 = pnand %p812_p12, %p806_p6 }
  0x21   : > { %816 = shalt.err (!%p813_p1)
}
  0x22   : > { %s817_s28 = scalar_lea.vmem %s1014_s8, 2048  ;;  %s916_s29 = smov [#allocation2]  }
  0x23   : > { %p818_p2 = scmp.ne.s32.totalorder %s1014_s8, %s817_s28  ;;  %s822_s30 = sshll.u32 %s916_s29, 4  ;;  %s823_s30 = int_to_ptr.vmem [resolvable:$false] %s822_s30 }
  0x24   : > { %s824_s4 = scalar_lea.vmem %s823_s30, 4096  ;;  %p825_p9 = scmp.lt.s32.totalorder %s1014_s8, %s823_s30 }
  0x25   : > { %p820_p5 = pnand %p818_p2, %p804_p3  ;;  %p826_p4 = scmp.lt.s32.totalorder %s824_s4, %s817_s28 }
  0x27   : > { %p821_p11 = pneg %p820_p5  ;;  %p827_p7 = por %p826_p4, %p825_p9 }
  0x29   : > { %p828_p10 = pnand %p827_p7, %p821_p11 }
  0x2b   : > { %831 = shalt.err (!%p828_p10)
}
  0x2c   : > { %s917_s5 = smov 128   ;;  %s918_s7 = smov 8  }
  0x2d   : > { %732 = dma.hbm_to_vmem [thread:$0]  (!%p1018_p0), %s1012_s6, 2048, %s1014_s8, %s1023_s10, %s917_s5, %s917_s5, %s918_s7  }
  0x2e   : > { %p173_p12 = scmp.lt.s32.totalorder %s914_s17, 3  ;;  %p1314_p1 = scmp.ge.s32.totalorder %s914_s17, 1 }
  0x30   : > { %p174_p3 = pnand %p1314_p1, %p173_p12 }
  0x31   : > { %s1055_s11 = sand.u32 (!%p174_p3), 1, %s898_s13  }
  0x32   : > { %177 = sbr.rel (%p174_p3) target bundleno = 337 (0x151), region = 32  ;;  %s644_s18 = sshll.u32 (!%p174_p3), %s1055_s11, 7 }
  0x33   : > { %s180_s19 = scalar_lea.sflag (!%p174_p3), [#allocation3], %s1055_s11  ;;  %s1061_s21 = scalar_lea.vmem (!%p174_p3), [#allocation2], %s644_s18 }
  0x39   : > { %885 = dma.done.wait (%p990_p8), %s180_s19, 2048  }
  0x3a   : > { %887 = vsyncadd (%p990_p8), %s180_s19, 4294965248  ;;  %v919_v0 = vmov 0   ;;  %v1068_v1 = vld [vmem:[%s1061_s21] sm:$0xff]  ;;  %v1071_v2 = vld [vmem:[%s1061_s21 + $0x8] sm:$0xff]  ;;  %s1215_s10 = scalar_lea.vmem [#allocation5], %s644_s18  ;;  %s660_s18 = sshll.u32 %s906_s15, 11 }
  0x3b   : > { %793 = vset.pattern.permute.xlu1 %v919_v0  ;;  %792 = vset.pattern.permute.xlu0 %v919_v0  ;;  %v1074_v3 = vld [vmem:[%s1061_s21 + $0x10] sm:$0xff]  ;;  %v239_v4 = vpack.c.bf16 %v1071_v2, %v1068_v1  ;;  %v1079_v5 = vld [vmem:[%s1061_s21 + $0x18] sm:$0xff]  ;;  %v1084_v7 = vld [vmem:[%s1061_s21 + $0x20] sm:$0xff]  ;;  %s551_s22 = sshll.u32 %s1215_s10, 4  ;;  %s1245_s23 = scalar_lea.hbm %s1307_s3, %s660_s18  ;;  %s1247_s22 = int_to_ptr.vmem [resolvable:$true] %s551_s22 }
  0x3c   : > { %v240_v6 = vpack.c.bf16 %v1079_v5, %v1074_v3  ;;  %v1087_v8 = vld [vmem:[%s1061_s21 + $0x28] sm:$0xff]  ;;  %v1090_v9 = vld [vmem:[%s1061_s21 + $0x30] sm:$0xff]  ;;  %v1095_v11 = vld [vmem:[%s1061_s21 + $0x38] sm:$0xff]  ;;  %s537_s28 = scalar_lea.sflag [#allocation4], %s1055_s11  ;;  %s832_s29 = scalar_lea.vmem %s1247_s22, 2048 }
  0x3d   : > { %677 = vmatprep.subr.bf16.mxu0 %v239_v4  ;;  %709 = vmatprep.subr.bf16.mxu1 %v239_v4  ;;  %v241_v10 = vpack.c.bf16 %v1087_v8, %v1084_v7  ;;  %v794_v12 = vld [vmem:[%s1305_s1] sm:$0xff]   ;;  %v242_v14 = vpack.c.bf16 %v1095_v11, %v1090_v9  ;;  %v1109_v16 = vld [vmem:[%s1061_s21 + $0x48] sm:$0xff]  ;;  %v249_v18 = vld [vmem:[%s1306_s2 + $0x10] sm:$0xff]  ;;  %p833_p8 = scmp.ne.s32.totalorder %s1247_s22, %s832_s29  ;;  %p1315_p9 = scmp.ne.s32.totalorder %s1311_s25, 0 }
  0x3e   : > { %678 = vmatpush3.bf16.msra.mxu0 %v239_v4  ;;  %717 = vmatpush3.bf16.msra.mxu1 %v239_v4  ;;  %v795_v13 = vld [vmem:[%s1305_s1 + $0x20] sm:$0xff]   ;;  %v1120_v20 = vld [vmem:[%s1061_s21 + $0x50] sm:$0xff]  ;;  %v1123_v21 = vld [vmem:[%s1061_s21 + $0x58] sm:$0xff]  ;;  %s920_s30 = smov [#allocation5]  }
  0x3f   : > { %679 = vmatprep.subr.bf16.mxu0 %v240_v6  ;;  %710 = vmatprep.subr.bf16.mxu1 %v240_v6  ;;  %v1106_v15 = vld [vmem:[%s1061_s21 + $0x40] sm:$0xff]  ;;  %v250_v22 = vld [vmem:[%s1306_s2 + $0x18] sm:$0xff]  ;;  %v248_v23 = vld [vmem:[%s1306_s2 + $0x8] sm:$0xff]  ;;  %v244_v24 = vpack.c.bf16 %v1123_v21, %v1120_v20  ;;  %p834_p11 = pnand %p833_p8, %p1315_p9  ;;  %s836_s4 = sshll.u32 %s920_s30, 4  ;;  %s837_s4 = int_to_ptr.vmem [resolvable:$false] %s836_s4 }
  0x40   : > { %693 = vmatprep.mubr.bf16.mxu0 %v794_v12  ;;  %701 = vmatprep.mubr.bf16.mxu1 %v795_v13  ;;  %v243_v17 = vpack.c.bf16 %v1109_v16, %v1106_v15  ;;  %v247_v19 = vld [vmem:[%s1306_s2] sm:$0xff]  ;;  %v1137_v26 = vld [vmem:[%s1061_s21 + $0x68] sm:$0xff]  ;;  %v1148_v30 = vld [vmem:[%s1061_s21 + $0x70] sm:$0xff]  ;;  %s838_s5 = scalar_lea.vmem %s837_s4, 4096  ;;  %p839_p6 = scmp.lt.s32.totalorder %s1247_s22, %s837_s4 }
  0x41   : > { %275 = vperm.xlu1 %793, %v249_v18   ;;  %265 = vperm.xlu0 %792, %v247_v19   ;;  %v1134_v25 = vld [vmem:[%s1061_s21 + $0x60] sm:$0xff]  ;;  %v252_v27 = vld [vmem:[%s1306_s2 + $0x28] sm:$0xff]  ;;  %v1151_v31 = vld [vmem:[%s1061_s21 + $0x78] sm:$0xff]  ;;  %p835_p0 = pneg %p834_p11  ;;  %p840_p13 = scmp.lt.s32.totalorder %s838_s5, %s832_s29 }
  0x42   : > { %680 = vmatpush3.bf16.msra.mxu0 %v240_v6  ;;  %718 = vmatpush3.bf16.msra.mxu1 %v240_v6  ;;  %v251_v28 = vld [vmem:[%s1306_s2 + $0x20] sm:$0xff]  ;;  %v245_v29 = vpack.c.bf16 %v1137_v26, %v1134_v25  ;;  %v254_v32 = vld [vmem:[%s1306_s2 + $0x38] sm:$0xff]  ;;  %v253_v33 = vld [vmem:[%s1306_s2 + $0x30] sm:$0xff]  ;;  %v246_v34 = vpack.c.bf16 %v1151_v31, %v1148_v30 }
  0x43   : > { %681 = vmatprep.subr.bf16.mxu0 %v241_v10  ;;  %711 = vmatprep.subr.bf16.mxu1 %v241_v10  ;;  %v256_v35 = vld [vmem:[%s1306_s2 + $0x48] sm:$0xff]  ;;  %v255_v36 = vld [vmem:[%s1306_s2 + $0x40] sm:$0xff]  ;;  %v258_v39 = vld [vmem:[%s1306_s2 + $0x58] sm:$0xff]  ;;  %p841_p2 = por %p840_p13, %p839_p6 }
  0x44   : > { %v796_v37 = vld [vmem:[%s1305_s1 + $0x8] sm:$0xff]   ;;  %v257_v40 = vld [vmem:[%s1306_s2 + $0x50] sm:$0xff]  ;;  %v259_v44 = vld [vmem:[%s1306_s2 + $0x60] sm:$0xff] }
  0x45   : > { %280 = vperm.xlu1 %793, %v250_v22   ;;  %270 = vperm.xlu0 %792, %v248_v23   ;;  %v797_v38 = vld [vmem:[%s1305_s1 + $0x28] sm:$0xff]   ;;  %v798_v41 = vld [vmem:[%s1305_s1 + $0x10] sm:$0xff]   ;;  %v800_v45 = vld [vmem:[%s1305_s1 + $0x18] sm:$0xff]   ;;  %p842_p5 = pnand %p841_p2, %p835_p0 }
  0x46   : > { %682 = vmatpush3.bf16.msra.mxu0 %v241_v10  ;;  %719 = vmatpush3.bf16.msra.mxu1 %v241_v10  ;;  %v799_v42 = vld [vmem:[%s1305_s1 + $0x30] sm:$0xff]   ;;  %v260_v43 = vld [vmem:[%s1306_s2 + $0x68] sm:$0xff]  ;;  %v801_v46 = vld [vmem:[%s1305_s1 + $0x38] sm:$0xff]  }
  0x47   : > { %683 = vmatprep.subr.bf16.mxu0 %v242_v14  ;;  %712 = vmatprep.subr.bf16.mxu1 %v242_v14  ;;  %v262_v47 = vld [vmem:[%s1306_s2 + $0x78] sm:$0xff]  ;;  %v261_v48 = vld [vmem:[%s1306_s2 + $0x70] sm:$0xff] }
  0x49   : > { %290 = vperm.xlu1 %793, %v252_v27   ;;  %285 = vperm.xlu0 %792, %v251_v28  }
  0x4a   : > { %684 = vmatpush3.bf16.msra.mxu0 %v242_v14  ;;  %720 = vmatpush3.bf16.msra.mxu1 %v242_v14 }
  0x4b   : > { %685 = vmatprep.subr.bf16.mxu0 %v243_v17  ;;  %713 = vmatprep.subr.bf16.mxu1 %v243_v17 }
  0x4d   : > { %300 = vperm.xlu1 %793, %v254_v32   ;;  %295 = vperm.xlu0 %792, %v253_v33  }
  0x4e   : > { %686 = vmatpush3.bf16.msra.mxu0 %v243_v17  ;;  %721 = vmatpush3.bf16.msra.mxu1 %v243_v17 }
  0x4f   : > { %687 = vmatprep.subr.bf16.mxu0 %v244_v24  ;;  %714 = vmatprep.subr.bf16.mxu1 %v244_v24 }
  0x51   : > { %310 = vperm.xlu1 %793, %v256_v35   ;;  %305 = vperm.xlu0 %792, %v255_v36  }
  0x52   : > { %688 = vmatpush3.bf16.msra.mxu0 %v244_v24  ;;  %722 = vmatpush3.bf16.msra.mxu1 %v244_v24 }
  0x53   : > { %689 = vmatprep.subr.bf16.mxu0 %v245_v29  ;;  %715 = vmatprep.subr.bf16.mxu1 %v245_v29 }
  0x55   : > { %320 = vperm.xlu1 %793, %v258_v39   ;;  %315 = vperm.xlu0 %792, %v257_v40  }
  0x56   : > { %690 = vmatpush3.bf16.msra.mxu0 %v245_v29  ;;  %723 = vmatpush3.bf16.msra.mxu1 %v245_v29 }
  0x57   : > { %691 = vmatprep.subr.bf16.mxu0 %v246_v34  ;;  %716 = vmatprep.subr.bf16.mxu1 %v246_v34 }
  0x59   : > { %330 = vperm.xlu1 %793, %v260_v43   ;;  %325 = vperm.xlu0 %792, %v259_v44  }
  0x5a   : > { %692 = vmatpush3.bf16.msra.mxu0 %v246_v34  ;;  %724 = vmatpush3.bf16.msra.mxu1 %v246_v34 }
  0x5d   : > { %694 = vmatmul.mubr.bf16.vlgmr.msra.gmra.mrb[0].mxu0 %v796_v37  ;;  %702 = vmatmul.mubr.bf16.vlgmr.msra.gmra.mrb[0].mxu1 %v797_v38 }
  0x5e   : > { %697 = vmatprep.mubr.bf16.mxu0 %v798_v41  ;;  %705 = vmatprep.mubr.bf16.mxu1 %v799_v42 }
  0x5f   : > { %340 = vperm.xlu1 %793, %v262_v47   ;;  %335 = vperm.xlu0 %792, %v261_v48  }
  0x65   : > { %698 = vmatmul.mubr.bf16.gmra.mrb[4].mxu0 %v800_v45  ;;  %706 = vmatmul.mubr.bf16.gmra.mrb[4].mxu1 %v801_v46 }
  0xc0   : > { %v276_v49 = vpop.permute.xlu1 %275  ;;  %v266_v50 = vpop.permute.xlu0 %265 }
  0xc4   : > { %v281_v51 = vpop.permute.xlu1 %280  ;;  %v271_v52 = vpop.permute.xlu0 %270 }
  0xc8   : > { %v1203_v53 = vpop.permute.xlu1 %290  ;;  %v286_v54 = vpop.permute.xlu0 %285 }
  0xcc   : > { %v1205_v55 = vpop.permute.xlu1 %300  ;;  %v296_v56 = vpop.permute.xlu0 %295 }
  0xd0   : > { %v311_v57 = vpop.permute.xlu1 %310  ;;  %v306_v58 = vpop.permute.xlu0 %305 }
  0xd4   : > { %v321_v59 = vpop.permute.xlu1 %320  ;;  %v316_v60 = vpop.permute.xlu0 %315 }
  0xd8   : > { %v1207_v61 = vpop.permute.xlu1 %330  ;;  %v326_v62 = vpop.permute.xlu0 %325 }
  0xde   : > { %v341_v43 = vpop.permute.xlu1 %340  ;;  %v336_v44 = vpop.permute.xlu0 %335 }
 0x130   : > { %v695_v63 = vpop.f32.mrb[0].mxu0  ;;  %v703_v0 = vpop.f32.mrb[0].mxu1 }
 0x131   : > { %v434_v4 = vadd.f32 %v695_v63, %v276_v49  ;;  %v466_v6 = vadd.f32 %v703_v0, %v316_v60  ;;  %v425_v10 = vpop.f32.mrb[1].mxu0  ;;  %v457_v12 = vpop.f32.mrb[1].mxu1 }
 0x132   : > { %v426_v13 = vadd.f32 %v425_v10, %v266_v50  ;;  %v458_v14 = vadd.f32 %v457_v12, %v306_v58  ;;  %v696_v17 = vpop.f32.mrb[2].mxu0  ;;  %v704_v18 = vpop.f32.mrb[2].mxu1 }
 0x133   : > { %v490_v19 = vmax.f32 %v434_v4, 0.0  ;;  %v498_v22 = vmax.f32 %v466_v6, 0.0  ;;  %v437_v23 = vadd.f32 %v696_v17, %v281_v51  ;;  %v469_v24 = vadd.f32 %v704_v18, %v321_v59  ;;  %v428_v27 = vpop.f32.mrb[3].mxu0  ;;  %v460_v28 = vpop.f32.mrb[3].mxu1 }
 0x134   : > { %v488_v29 = vmax.f32 %v426_v13, 0.0  ;;  %v496_v32 = vmax.f32 %v458_v14, 0.0  ;;  %v429_v33 = vadd.f32 %v428_v27, %v271_v52  ;;  %v461_v34 = vadd.f32 %v460_v28, %v311_v57 }
 0x135   : > { %v506_v35 = vadd.f32 %v490_v19, %v1074_v3  ;;  %v514_v36 = vadd.f32 %v498_v22, %v1120_v20  ;;  %v491_v37 = vmax.f32 %v437_v23, 0.0  ;;  %v499_v38 = vmax.f32 %v469_v24, 0.0 }
 0x136   : > { %v504_v39 = vadd.f32 %v488_v29, %v1068_v1  ;;  %v512_v40 = vadd.f32 %v496_v32, %v1106_v15  ;;  %v489_v41 = vmax.f32 %v429_v33, 0.0  ;;  %v497_v42 = vmax.f32 %v461_v34, 0.0 }
 0x137   : > { %522 = vst [vmem:[%s1215_s10 + $0x10] sm:$0xff] %v506_v35  ;;  %530 = vst [vmem:[%s1215_s10 + $0x50] sm:$0xff] %v514_v36  ;;  %v507_v1 = vadd.f32 %v491_v37, %v1079_v5  ;;  %v515_v3 = vadd.f32 %v499_v38, %v1123_v21 }
 0x138   : > { %520 = vst [vmem:[%s1215_s10] sm:$0xff] %v504_v39  ;;  %528 = vst [vmem:[%s1215_s10 + $0x40] sm:$0xff] %v512_v40  ;;  %v505_v15 = vadd.f32 %v489_v41, %v1071_v2  ;;  %v513_v20 = vadd.f32 %v497_v42, %v1109_v16  ;;  %v699_v45 = vpop.f32.mrb[4].mxu0  ;;  %v707_v46 = vpop.f32.mrb[4].mxu1 }
 0x139   : > { %523 = vst [vmem:[%s1215_s10 + $0x18] sm:$0xff] %v507_v1  ;;  %531 = vst [vmem:[%s1215_s10 + $0x58] sm:$0xff] %v515_v3  ;;  %v450_v47 = vadd.f32 %v699_v45, %v296_v56  ;;  %v482_v48 = vadd.f32 %v707_v46, %v336_v44  ;;  %v441_v49 = vpop.f32.mrb[5].mxu0  ;;  %v473_v50 = vpop.f32.mrb[5].mxu1 }
 0x13a   : > { %521 = vst [vmem:[%s1215_s10 + $0x8] sm:$0xff] %v505_v15  ;;  %529 = vst [vmem:[%s1215_s10 + $0x48] sm:$0xff] %v513_v20  ;;  %v442_v5 = vadd.f32 %v441_v49, %v286_v54  ;;  %v474_v21 = vadd.f32 %v473_v50, %v326_v62  ;;  %v700_v51 = vpop.f32.mrb[6].mxu0  ;;  %v708_v52 = vpop.f32.mrb[6].mxu1 }
 0x13b   : > { %v494_v57 = vmax.f32 %v450_v47, 0.0  ;;  %v502_v2 = vmax.f32 %v482_v48, 0.0  ;;  %v453_v16 = vadd.f32 %v700_v51, %v1205_v55  ;;  %v485_v58 = vadd.f32 %v708_v52, %v341_v43  ;;  %v444_v59 = vpop.f32.mrb[7].mxu0  ;;  %v476_v60 = vpop.f32.mrb[7].mxu1 }
 0x13c   : > { %v492_v56 = vmax.f32 %v442_v5, 0.0  ;;  %v500_v63 = vmax.f32 %v474_v21, 0.0  ;;  %v445_v0 = vadd.f32 %v444_v59, %v1203_v53  ;;  %v477_v4 = vadd.f32 %v476_v60, %v1207_v61 }
 0x13d   : > { %v510_v54 = vadd.f32 %v494_v57, %v1090_v9  ;;  %v518_v62 = vadd.f32 %v502_v2, %v1148_v30  ;;  %v495_v55 = vmax.f32 %v453_v16, 0.0  ;;  %v503_v6 = vmax.f32 %v485_v58, 0.0 }
 0x13e   : > { %v508_v10 = vadd.f32 %v492_v56, %v1084_v7  ;;  %v516_v12 = vadd.f32 %v500_v63, %v1134_v25  ;;  %v493_v53 = vmax.f32 %v445_v0, 0.0  ;;  %v501_v61 = vmax.f32 %v477_v4, 0.0 }
 0x13f   : > { %526 = vst [vmem:[%s1215_s10 + $0x30] sm:$0xff] %v510_v54  ;;  %534 = vst [vmem:[%s1215_s10 + $0x70] sm:$0xff] %v518_v62  ;;  %v511_v9 = vadd.f32 %v495_v55, %v1095_v11  ;;  %v519_v30 = vadd.f32 %v503_v6, %v1151_v31 }
 0x140   : > { %524 = vst [vmem:[%s1215_s10 + $0x20] sm:$0xff] %v508_v10  ;;  %532 = vst [vmem:[%s1215_s10 + $0x60] sm:$0xff] %v516_v12  ;;  %v509_v7 = vadd.f32 %v493_v53, %v1087_v8  ;;  %v517_v25 = vadd.f32 %v501_v61, %v1137_v26 }
 0x141   : > { %527 = vst [vmem:[%s1215_s10 + $0x38] sm:$0xff] %v511_v9  ;;  %535 = vst [vmem:[%s1215_s10 + $0x78] sm:$0xff] %v519_v30 }
 0x142   : > { %525 = vst [vmem:[%s1215_s10 + $0x28] sm:$0xff] %v509_v7  ;;  %533 = vst [vmem:[%s1215_s10 + $0x68] sm:$0xff] %v517_v25 }
 0x143   : > { %845 = shalt.err (!%p842_p5)
}
 0x144   : > { %s846_s7 = scalar_lea.hbm %s1245_s23, 2048  ;;  %s850_s6 = scalar_lea.hbm %s1307_s3, 4096 }
 0x145   : > { %p847_p4 = scmp.ne.s32.totalorder %s1245_s23, %s846_s7  ;;  %p851_p12 = scmp.lt.u32.totalorder %s1245_s23, %s1307_s3 }
 0x146   : > { %p852_p1 = scmp.lt.u32.totalorder %s850_s6, %s846_s7  ;;  %p854_p8 = scmp.lt.u32.totalorder %s846_s7, %s1245_s23 }
 0x147   : > { %p848_p7 = pnand %p847_p4, %p1315_p9 }
 0x148   : > { %p853_p3 = por %p852_p1, %p851_p12 }
 0x149   : > { %p849_p10 = pneg %p848_p7 }
 0x14a   : > { %p855_p11 = por %p854_p8, %p853_p3 }
 0x14c   : > { %p856_p0 = pnand %p855_p11, %p849_p10 }
 0x14e   : > { %859 = shalt.err (!%p856_p0)
}
 0x14f   : > { %s921_s10 = smov 128   ;;  %s922_s18 = smov 8  }
 0x150   : > { %727 = dma.vmem_to_hbm [thread:$0]  (%p1315_p9), %s1247_s22, 2048, %s1245_s23, %s537_s28, %s921_s10, %s921_s10, %s922_s18  }
 0x151 PF: > { %s566_s15 = sand.u32 1, %s894_s12   ;;  %p1316_p6 = scmp.ne.s32.totalorder %s1312_s27, 0 }
 0x152   : > { %p1317_p13 = scmp.ge.s32.totalorder %s914_s17, 2  ;;  %s567_s21 = scalar_lea.sflag [#allocation4], %s566_s15 }
 0x154   : > { %p734_p2 = pnand %p1317_p13, %p1316_p6 }
 0x156   : > { %889 = dma.done.wait (!%p734_p2), %s567_s21, 2048  }
 0x157   : > { %891 = vsyncadd (!%p734_p2), %s567_s21, 4294965248  ;;  %s19_s17 = sadd.s32 1, %s914_s17   ;;  %s1318_s12 = smov %s898_s13 }
 0x158   : > { %p16_p5 = scmp.ge.s32.totalorder %s19_s17, 4   ;;  %s1319_s13 = smov %s902_s14 }
 0x159   : > { %s1320_s14 = smov %s999_s26  ;;  %s1321_s15 = smov %s910_s16 }
 0x15a   : > { %s1322_s16 = smov %s1324_s20  ;;  %18 = sbr.rel (!%p16_p5) target bundleno = 6 (0x6), region = 77 }
 0x161   :  { %572 = vsyncpa [#allocation3], 1 }
 0x162   :  { %574 = vsyncpa [#allocation3 + $0x1], 1 }
 0x163   :  { %575 = vsyncpa [#allocation4], 1 }
 0x164   :  { %577 = vsyncpa [#allocation4 + $0x1], 1 }

// kernel: tpu_custom_call.1
= control target key start
LH: loop header
LB: loop body
LE: loop exit
PB: predicated region body
PF: predicated region fallthrough
CT: control target
= control target key end

     0   :  { %8 = vsyncpa [#allocation3], 0  ;;  %s1304_s0 = inlined_call_operand.hbm [shape: f32[2,128,128], index: 0, kind: input, shape index: {}]   ;;  %s1305_s1 = inlined_call_operand.vmem [shape: bf16[128,128], index: 1, kind: input, shape index: {}]   ;;  %s1306_s2 = inlined_call_operand.vmem [shape: f32[128,1], index: 2, kind: input, shape index: {}]   ;;  %s1307_s3 = inlined_call_operand.hbm [shape: f32[2,128,128], index: 3, kind: output, shape index: {}]  }
   0x1   :  { %10 = vsyncpa [#allocation3 + $0x1], 0 }
   0x2   :  { %11 = vsyncpa [#allocation4], 0 }
   0x3   :  { %13 = vsyncpa [#allocation4 + $0x1], 0  ;;  %s943_s12 = smov 0   ;;  %s945_s13 = smov 0  }
   0x4   :  { %s947_s14 = smov 0   ;;  %s949_s15 = smov 0  }
   0x5   :  { %s951_s16 = smov 0   ;;  %s953_s17 = smov 0  }
   0x6 LB: > { %s636_s18 = sadd.s32 4294967295, %s914_s17   ;;  %s637_s19 = sadd.s32 4294967294, %s914_s17   ;;  %s914_s17 = sphi %s953_s17, %s19_s17   ;;  %s910_s16 = sphi %s951_s16, %s1322_s16   ;;  %s906_s15 = sphi %s949_s15, %s1321_s15   ;;  %s902_s14 = sphi %s947_s14, %s1320_s14   ;;  %s898_s13 = sphi %s945_s13, %s1319_s13   ;;  %s894_s12 = sphi %s943_s12, %s1318_s12  }
   0x7   : > { %s31_s20 = sadd.s32 1, %s910_s16  ;;  %s40_s21 = sadd.s32 1, %s902_s14 }
   0x8   : > { %p33_p0 = scmp.ge.s32.totalorder %s31_s20, 2  ;;  %p47_p1 = scmp.ne.s32.totalorder %s902_s14, %s898_s13 }
   0x9   : > { %p48_p2 = scmp.eq.s32.totalorder %s914_s17, 0  ;;  %p53_p3 = scmp.ne.s32.totalorder %s898_s13, %s894_s12 }
   0xa   : > { %s1324_s20 = smov (%p33_p0, %s31_s20), 0  ;;  %p54_p5 = scmp.eq.s32.totalorder %s636_s18, 0 }
   0xb   : > { %p984_p4 = por %p48_p2, %p47_p1  ;;  %s35_s23 = ssub.s32 %s910_s16, %s1324_s20 }
   0xc   : > { %p121_p6 = scmp.eq.s32.totalorder %s636_s18, 1  ;;  %p38_p7 = scmp.eq.s32.totalorder %s35_s23, 0 }
   0xd   : > { %p990_p8 = por %p54_p5, %p53_p3  ;;  %p127_p10 = scmp.eq.s32.totalorder %s637_s19, 1 }
   0xe   : > { %p994_p9 = por %p121_p6, %p47_p1  ;;  %p737_p13 = scmp.lt.s32.totalorder %s914_s17, 2 }
   0xf   : > { %s999_s26 = scalar_select %p38_p7, %s902_s14, %s40_s21  }
  0x10   : > { %s1311_s25 = scalar_select %p994_p9, 1, 0 }
  0x11   : > { %p1001_p11 = por %p127_p10, %p53_p3  ;;  %s153_s28 = sand.u32 1, %s902_s14  }
  0x12   : > { %s640_s29 = sshll.u32 %s153_s28, 7  ;;  %s659_s30 = sshll.u32 %s910_s16, 11 }
  0x13   : > { %s1312_s27 = scalar_select %p1001_p11, 1, 0 }
  0x14   : > { %s1012_s6 = scalar_lea.hbm %s1304_s0, %s659_s30  ;;  %s157_s7 = scalar_lea.vmem [#allocation2], %s640_s29 }
  0x15   : > { %s165_s8 = sshll.u32 %s157_s7, 4  ;;  %p1018_p0 = pnand %p737_p13, %p984_p4  ;;  %s1014_s8 = int_to_ptr.vmem [resolvable:$true] %s165_s8 }
  0x16   : > { %s1023_s10 = scalar_lea.sflag [#allocation3], %s153_s28  ;;  %s802_s11 = scalar_lea.hbm %s1012_s6, 2048 }
  0x17   : > { %p803_p2 = scmp.ne.s32.totalorder %s1012_s6, %s802_s11  ;;  %p804_p3 = pneg %p1018_p0 }
  0x18   : > { %s807_s21 = scalar_lea.hbm %s1304_s0, 4096  ;;  %p808_p4 = scmp.lt.u32.totalorder %s1012_s6, %s1304_s0 }
  0x19   : > { %p805_p5 = pnand %p804_p3, %p803_p2  ;;  %p809_p7 = scmp.lt.u32.totalorder %s807_s21, %s802_s11 }
  0x1a   : > { %p811_p13 = scmp.lt.u32.totalorder %s802_s11, %s1012_s6 }
  0x1b   : > { %p806_p6 = pneg %p805_p5  ;;  %p810_p10 = por %p809_p7, %p808_p4 }
  0x1d   : > { %p812_p12 = por %p811_p13, %p810_p10 }
  0x1f   : > { %p813_p1 = pnand %p812_p12, %p806_p6 }
  0x21   : > { %816 = shalt.err (!%p813_p1)
}
  0x22   : > { %s817_s28 = scalar_lea.vmem %s1014_s8, 2048  ;;  %s916_s29 = smov [#allocation2]  }
  0x23   : > { %p818_p2 = scmp.ne.s32.totalorder %s1014_s8, %s817_s28  ;;  %s822_s30 = sshll.u32 %s916_s29, 4  ;;  %s823_s30 = int_to_ptr.vmem [resolvable:$false] %s822_s30 }
  0x24   : > { %s824_s4 = scalar_lea.vmem %s823_s30, 4096  ;;  %p825_p9 = scmp.lt.s32.totalorder %s1014_s8, %s823_s30 }
  0x25   : > { %p820_p5 = pnand %p818_p2, %p804_p3  ;;  %p826_p4 = scmp.lt.s32.totalorder %s824_s4, %s817_s28 }
  0x27   : > { %p821_p11 = pneg %p820_p5  ;;  %p827_p7 = por %p826_p4, %p825_p9 }
  0x29   : > { %p828_p10 = pnand %p827_p7, %p821_p11 }
  0x2b   : > { %831 = shalt.err (!%p828_p10)
}
  0x2c   : > { %s917_s5 = smov 128   ;;  %s918_s7 = smov 8  }
  0x2d   : > { %732 = dma.hbm_to_vmem [thread:$0]  (!%p1018_p0), %s1012_s6, 2048, %s1014_s8, %s1023_s10, %s917_s5, %s917_s5, %s918_s7  }
  0x2e   : > { %p173_p12 = scmp.lt.s32.totalorder %s914_s17, 3  ;;  %p1314_p1 = scmp.ge.s32.totalorder %s914_s17, 1 }
  0x30   : > { %p174_p3 = pnand %p1314_p1, %p173_p12 }
  0x31   : > { %s1055_s11 = sand.u32 (!%p174_p3), 1, %s898_s13  }
  0x32   : > { %177 = sbr.rel (%p174_p3) target bundleno = 337 (0x151), region = 32  ;;  %s644_s18 = sshll.u32 (!%p174_p3), %s1055_s11, 7 }
  0x33   : > { %s180_s19 = scalar_lea.sflag (!%p174_p3), [#allocation3], %s1055_s11  ;;  %s1061_s21 = scalar_lea.vmem (!%p174_p3), [#allocation2], %s644_s18 }
  0x39   : > { %885 = dma.done.wait (%p990_p8), %s180_s19, 2048  }
  0x3a   : > { %887 = vsyncadd (%p990_p8), %s180_s19, 4294965248  ;;  %v919_v0 = vmov 0   ;;  %v1068_v1 = vld [vmem:[%s1061_s21] sm:$0xff]  ;;  %v1071_v2 = vld [vmem:[%s1061_s21 + $0x8] sm:$0xff]  ;;  %s1215_s10 = scalar_lea.vmem [#allocation5], %s644_s18  ;;  %s660_s18 = sshll.u32 %s906_s15, 11 }
  0x3b   : > { %793 = vset.pattern.permute.xlu1 %v919_v0  ;;  %792 = vset.pattern.permute.xlu0 %v919_v0  ;;  %v1074_v3 = vld [vmem:[%s1061_s21 + $0x10] sm:$0xff]  ;;  %v239_v4 = vpack.c.bf16 %v1071_v2, %v1068_v1  ;;  %v1079_v5 = vld [vmem:[%s1061_s21 + $0x18] sm:$0xff]  ;;  %v1084_v7 = vld [vmem:[%s1061_s21 + $0x20] sm:$0xff]  ;;  %s551_s22 = sshll.u32 %s1215_s10, 4  ;;  %s1245_s23 = scalar_lea.hbm %s1307_s3, %s660_s18  ;;  %s1247_s22 = int_to_ptr.vmem [resolvable:$true] %s551_s22 }
  0x3c   : > { %v240_v6 = vpack.c.bf16 %v1079_v5, %v1074_v3  ;;  %v1087_v8 = vld [vmem:[%s1061_s21 + $0x28] sm:$0xff]  ;;  %v1090_v9 = vld [vmem:[%s1061_s21 + $0x30] sm:$0xff]  ;;  %v1095_v11 = vld [vmem:[%s1061_s21 + $0x38] sm:$0xff]  ;;  %s537_s28 = scalar_lea.sflag [#allocation4], %s1055_s11  ;;  %s832_s29 = scalar_lea.vmem %s1247_s22, 2048 }
  0x3d   : > { %677 = vmatprep.subr.bf16.mxu0 %v239_v4  ;;  %709 = vmatprep.subr.bf16.mxu1 %v239_v4  ;;  %v241_v10 = vpack.c.bf16 %v1087_v8, %v1084_v7  ;;  %v794_v12 = vld [vmem:[%s1305_s1] sm:$0xff]   ;;  %v242_v14 = vpack.c.bf16 %v1095_v11, %v1090_v9  ;;  %v1109_v16 = vld [vmem:[%s1061_s21 + $0x48] sm:$0xff]  ;;  %v249_v18 = vld [vmem:[%s1306_s2 + $0x10] sm:$0xff]  ;;  %p833_p8 = scmp.ne.s32.totalorder %s1247_s22, %s832_s29  ;;  %p1315_p9 = scmp.ne.s32.totalorder %s1311_s25, 0 }
  0x3e   : > { %678 = vmatpush3.bf16.msra.mxu0 %v239_v4  ;;  %717 = vmatpush3.bf16.msra.mxu1 %v239_v4  ;;  %v795_v13 = vld [vmem:[%s1305_s1 + $0x20] sm:$0xff]   ;;  %v1120_v20 = vld [vmem:[%s1061_s21 + $0x50] sm:$0xff]  ;;  %v1123_v21 = vld [vmem:[%s1061_s21 + $0x58] sm:$0xff]  ;;  %s920_s30 = smov [#allocation5]  }
  0x3f   : > { %679 = vmatprep.subr.bf16.mxu0 %v240_v6  ;;  %710 = vmatprep.subr.bf16.mxu1 %v240_v6  ;;  %v1106_v15 = vld [vmem:[%s1061_s21 + $0x40] sm:$0xff]  ;;  %v250_v22 = vld [vmem:[%s1306_s2 + $0x18] sm:$0xff]  ;;  %v248_v23 = vld [vmem:[%s1306_s2 + $0x8] sm:$0xff]  ;;  %v244_v24 = vpack.c.bf16 %v1123_v21, %v1120_v20  ;;  %p834_p11 = pnand %p833_p8, %p1315_p9  ;;  %s836_s4 = sshll.u32 %s920_s30, 4  ;;  %s837_s4 = int_to_ptr.vmem [resolvable:$false] %s836_s4 }
  0x40   : > { %693 = vmatprep.mubr.bf16.mxu0 %v794_v12  ;;  %701 = vmatprep.mubr.bf16.mxu1 %v795_v13  ;;  %v243_v17 = vpack.c.bf16 %v1109_v16, %v1106_v15  ;;  %v247_v19 = vld [vmem:[%s1306_s2] sm:$0xff]  ;;  %v1137_v26 = vld [vmem:[%s1061_s21 + $0x68] sm:$0xff]  ;;  %v1148_v30 = vld [vmem:[%s1061_s21 + $0x70] sm:$0xff]  ;;  %s838_s5 = scalar_lea.vmem %s837_s4, 4096  ;;  %p839_p6 = scmp.lt.s32.totalorder %s1247_s22, %s837_s4 }
  0x41   : > { %275 = vperm.xlu1 %793, %v249_v18   ;;  %265 = vperm.xlu0 %792, %v247_v19   ;;  %v1134_v25 = vld [vmem:[%s1061_s21 + $0x60] sm:$0xff]  ;;  %v252_v27 = vld [vmem:[%s1306_s2 + $0x28] sm:$0xff]  ;;  %v1151_v31 = vld [vmem:[%s1061_s21 + $0x78] sm:$0xff]  ;;  %p835_p0 = pneg %p834_p11  ;;  %p840_p13 = scmp.lt.s32.totalorder %s838_s5, %s832_s29 }
  0x42   : > { %680 = vmatpush3.bf16.msra.mxu0 %v240_v6  ;;  %718 = vmatpush3.bf16.msra.mxu1 %v240_v6  ;;  %v251_v28 = vld [vmem:[%s1306_s2 + $0x20] sm:$0xff]  ;;  %v245_v29 = vpack.c.bf16 %v1137_v26, %v1134_v25  ;;  %v254_v32 = vld [vmem:[%s1306_s2 + $0x38] sm:$0xff]  ;;  %v253_v33 = vld [vmem:[%s1306_s2 + $0x30] sm:$0xff]  ;;  %v246_v34 = vpack.c.bf16 %v1151_v31, %v1148_v30 }
  0x43   : > { %681 = vmatprep.subr.bf16.mxu0 %v241_v10  ;;  %711 = vmatprep.subr.bf16.mxu1 %v241_v10  ;;  %v256_v35 = vld [vmem:[%s1306_s2 + $0x48] sm:$0xff]  ;;  %v255_v36 = vld [vmem:[%s1306_s2 + $0x40] sm:$0xff]  ;;  %v258_v39 = vld [vmem:[%s1306_s2 + $0x58] sm:$0xff]  ;;  %p841_p2 = por %p840_p13, %p839_p6 }
  0x44   : > { %v796_v37 = vld [vmem:[%s1305_s1 + $0x8] sm:$0xff]   ;;  %v257_v40 = vld [vmem:[%s1306_s2 + $0x50] sm:$0xff]  ;;  %v259_v44 = vld [vmem:[%s1306_s2 + $0x60] sm:$0xff] }
  0x45   : > { %280 = vperm.xlu1 %793, %v250_v22   ;;  %270 = vperm.xlu0 %792, %v248_v23   ;;  %v797_v38 = vld [vmem:[%s1305_s1 + $0x28] sm:$0xff]   ;;  %v798_v41 = vld [vmem:[%s1305_s1 + $0x10] sm:$0xff]   ;;  %v800_v45 = vld [vmem:[%s1305_s1 + $0x18] sm:$0xff]   ;;  %p842_p5 = pnand %p841_p2, %p835_p0 }
  0x46   : > { %682 = vmatpush3.bf16.msra.mxu0 %v241_v10  ;;  %719 = vmatpush3.bf16.msra.mxu1 %v241_v10  ;;  %v799_v42 = vld [vmem:[%s1305_s1 + $0x30] sm:$0xff]   ;;  %v260_v43 = vld [vmem:[%s1306_s2 + $0x68] sm:$0xff]  ;;  %v801_v46 = vld [vmem:[%s1305_s1 + $0x38] sm:$0xff]  }
  0x47   : > { %683 = vmatprep.subr.bf16.mxu0 %v242_v14  ;;  %712 = vmatprep.subr.bf16.mxu1 %v242_v14  ;;  %v262_v47 = vld [vmem:[%s1306_s2 + $0x78] sm:$0xff]  ;;  %v261_v48 = vld [vmem:[%s1306_s2 + $0x70] sm:$0xff] }
  0x49   : > { %290 = vperm.xlu1 %793, %v252_v27   ;;  %285 = vperm.xlu0 %792, %v251_v28  }
  0x4a   : > { %684 = vmatpush3.bf16.msra.mxu0 %v242_v14  ;;  %720 = vmatpush3.bf16.msra.mxu1 %v242_v14 }
  0x4b   : > { %685 = vmatprep.subr.bf16.mxu0 %v243_v17  ;;  %713 = vmatprep.subr.bf16.mxu1 %v243_v17 }
  0x4d   : > { %300 = vperm.xlu1 %793, %v254_v32   ;;  %295 = vperm.xlu0 %792, %v253_v33  }
  0x4e   : > { %686 = vmatpush3.bf16.msra.mxu0 %v243_v17  ;;  %721 = vmatpush3.bf16.msra.mxu1 %v243_v17 }
  0x4f   : > { %687 = vmatprep.subr.bf16.mxu0 %v244_v24  ;;  %714 = vmatprep.subr.bf16.mxu1 %v244_v24 }
  0x51   : > { %310 = vperm.xlu1 %793, %v256_v35   ;;  %305 = vperm.xlu0 %792, %v255_v36  }
  0x52   : > { %688 = vmatpush3.bf16.msra.mxu0 %v244_v24  ;;  %722 = vmatpush3.bf16.msra.mxu1 %v244_v24 }
  0x53   : > { %689 = vmatprep.subr.bf16.mxu0 %v245_v29  ;;  %715 = vmatprep.subr.bf16.mxu1 %v245_v29 }
  0x55   : > { %320 = vperm.xlu1 %793, %v258_v39   ;;  %315 = vperm.xlu0 %792, %v257_v40  }
  0x56   : > { %690 = vmatpush3.bf16.msra.mxu0 %v245_v29  ;;  %723 = vmatpush3.bf16.msra.mxu1 %v245_v29 }
  0x57   : > { %691 = vmatprep.subr.bf16.mxu0 %v246_v34  ;;  %716 = vmatprep.subr.bf16.mxu1 %v246_v34 }
  0x59   : > { %330 = vperm.xlu1 %793, %v260_v43   ;;  %325 = vperm.xlu0 %792, %v259_v44  }
  0x5a   : > { %692 = vmatpush3.bf16.msra.mxu0 %v246_v34  ;;  %724 = vmatpush3.bf16.msra.mxu1 %v246_v34 }
  0x5d   : > { %694 = vmatmul.mubr.bf16.vlgmr.msra.gmra.mrb[0].mxu0 %v796_v37  ;;  %702 = vmatmul.mubr.bf16.vlgmr.msra.gmra.mrb[0].mxu1 %v797_v38 }
  0x5e   : > { %697 = vmatprep.mubr.bf16.mxu0 %v798_v41  ;;  %705 = vmatprep.mubr.bf16.mxu1 %v799_v42 }
  0x5f   : > { %340 = vperm.xlu1 %793, %v262_v47   ;;  %335 = vperm.xlu0 %792, %v261_v48  }
  0x65   : > { %698 = vmatmul.mubr.bf16.gmra.mrb[4].mxu0 %v800_v45  ;;  %706 = vmatmul.mubr.bf16.gmra.mrb[4].mxu1 %v801_v46 }
  0xc0   : > { %v276_v49 = vpop.permute.xlu1 %275  ;;  %v266_v50 = vpop.permute.xlu0 %265 }
  0xc4   : > { %v281_v51 = vpop.permute.xlu1 %280  ;;  %v271_v52 = vpop.permute.xlu0 %270 }
  0xc8   : > { %v1203_v53 = vpop.permute.xlu1 %290  ;;  %v286_v54 = vpop.permute.xlu0 %285 }
  0xcc   : > { %v1205_v55 = vpop.permute.xlu1 %300  ;;  %v296_v56 = vpop.permute.xlu0 %295 }
  0xd0   : > { %v311_v57 = vpop.permute.xlu1 %310  ;;  %v306_v58 = vpop.permute.xlu0 %305 }
  0xd4   : > { %v321_v59 = vpop.permute.xlu1 %320  ;;  %v316_v60 = vpop.permute.xlu0 %315 }
  0xd8   : > { %v1207_v61 = vpop.permute.xlu1 %330  ;;  %v326_v62 = vpop.permute.xlu0 %325 }
  0xde   : > { %v341_v43 = vpop.permute.xlu1 %340  ;;  %v336_v44 = vpop.permute.xlu0 %335 }
 0x130   : > { %v695_v63 = vpop.f32.mrb[0].mxu0  ;;  %v703_v0 = vpop.f32.mrb[0].mxu1 }
 0x131   : > { %v434_v4 = vadd.f32 %v695_v63, %v276_v49  ;;  %v466_v6 = vadd.f32 %v703_v0, %v316_v60  ;;  %v425_v10 = vpop.f32.mrb[1].mxu0  ;;  %v457_v12 = vpop.f32.mrb[1].mxu1 }
 0x132   : > { %v426_v13 = vadd.f32 %v425_v10, %v266_v50  ;;  %v458_v14 = vadd.f32 %v457_v12, %v306_v58  ;;  %v696_v17 = vpop.f32.mrb[2].mxu0  ;;  %v704_v18 = vpop.f32.mrb[2].mxu1 }
 0x133   : > { %v490_v19 = vmax.f32 %v434_v4, 0.0  ;;  %v498_v22 = vmax.f32 %v466_v6, 0.0  ;;  %v437_v23 = vadd.f32 %v696_v17, %v281_v51  ;;  %v469_v24 = vadd.f32 %v704_v18, %v321_v59  ;;  %v428_v27 = vpop.f32.mrb[3].mxu0  ;;  %v460_v28 = vpop.f32.mrb[3].mxu1 }
 0x134   : > { %v488_v29 = vmax.f32 %v426_v13, 0.0  ;;  %v496_v32 = vmax.f32 %v458_v14, 0.0  ;;  %v429_v33 = vadd.f32 %v428_v27, %v271_v52  ;;  %v461_v34 = vadd.f32 %v460_v28, %v311_v57 }
 0x135   : > { %v506_v35 = vadd.f32 %v490_v19, %v1074_v3  ;;  %v514_v36 = vadd.f32 %v498_v22, %v1120_v20  ;;  %v491_v37 = vmax.f32 %v437_v23, 0.0  ;;  %v499_v38 = vmax.f32 %v469_v24, 0.0 }
 0x136   : > { %v504_v39 = vadd.f32 %v488_v29, %v1068_v1  ;;  %v512_v40 = vadd.f32 %v496_v32, %v1106_v15  ;;  %v489_v41 = vmax.f32 %v429_v33, 0.0  ;;  %v497_v42 = vmax.f32 %v461_v34, 0.0 }
 0x137   : > { %522 = vst [vmem:[%s1215_s10 + $0x10] sm:$0xff] %v506_v35  ;;  %530 = vst [vmem:[%s1215_s10 + $0x50] sm:$0xff] %v514_v36  ;;  %v507_v1 = vadd.f32 %v491_v37, %v1079_v5  ;;  %v515_v3 = vadd.f32 %v499_v38, %v1123_v21 }
 0x138   : > { %520 = vst [vmem:[%s1215_s10] sm:$0xff] %v504_v39  ;;  %528 = vst [vmem:[%s1215_s10 + $0x40] sm:$0xff] %v512_v40  ;;  %v505_v15 = vadd.f32 %v489_v41, %v1071_v2  ;;  %v513_v20 = vadd.f32 %v497_v42, %v1109_v16  ;;  %v699_v45 = vpop.f32.mrb[4].mxu0  ;;  %v707_v46 = vpop.f32.mrb[4].mxu1 }
 0x139   : > { %523 = vst [vmem:[%s1215_s10 + $0x18] sm:$0xff] %v507_v1  ;;  %531 = vst [vmem:[%s1215_s10 + $0x58] sm:$0xff] %v515_v3  ;;  %v450_v47 = vadd.f32 %v699_v45, %v296_v56  ;;  %v482_v48 = vadd.f32 %v707_v46, %v336_v44  ;;  %v441_v49 = vpop.f32.mrb[5].mxu0  ;;  %v473_v50 = vpop.f32.mrb[5].mxu1 }
 0x13a   : > { %521 = vst [vmem:[%s1215_s10 + $0x8] sm:$0xff] %v505_v15  ;;  %529 = vst [vmem:[%s1215_s10 + $0x48] sm:$0xff] %v513_v20  ;;  %v442_v5 = vadd.f32 %v441_v49, %v286_v54  ;;  %v474_v21 = vadd.f32 %v473_v50, %v326_v62  ;;  %v700_v51 = vpop.f32.mrb[6].mxu0  ;;  %v708_v52 = vpop.f32.mrb[6].mxu1 }
 0x13b   : > { %v494_v57 = vmax.f32 %v450_v47, 0.0  ;;  %v502_v2 = vmax.f32 %v482_v48, 0.0  ;;  %v453_v16 = vadd.f32 %v700_v51, %v1205_v55  ;;  %v485_v58 = vadd.f32 %v708_v52, %v341_v43  ;;  %v444_v59 = vpop.f32.mrb[7].mxu0  ;;  %v476_v60 = vpop.f32.mrb[7].mxu1 }
 0x13c   : > { %v492_v56 = vmax.f32 %v442_v5, 0.0  ;;  %v500_v63 = vmax.f32 %v474_v21, 0.0  ;;  %v445_v0 = vadd.f32 %v444_v59, %v1203_v53  ;;  %v477_v4 = vadd.f32 %v476_v60, %v1207_v61 }
 0x13d   : > { %v510_v54 = vadd.f32 %v494_v57, %v1090_v9  ;;  %v518_v62 = vadd.f32 %v502_v2, %v1148_v30  ;;  %v495_v55 = vmax.f32 %v453_v16, 0.0  ;;  %v503_v6 = vmax.f32 %v485_v58, 0.0 }
 0x13e   : > { %v508_v10 = vadd.f32 %v492_v56, %v1084_v7  ;;  %v516_v12 = vadd.f32 %v500_v63, %v1134_v25  ;;  %v493_v53 = vmax.f32 %v445_v0, 0.0  ;;  %v501_v61 = vmax.f32 %v477_v4, 0.0 }
 0x13f   : > { %526 = vst [vmem:[%s1215_s10 + $0x30] sm:$0xff] %v510_v54  ;;  %534 = vst [vmem:[%s1215_s10 + $0x70] sm:$0xff] %v518_v62  ;;  %v511_v9 = vadd.f32 %v495_v55, %v1095_v11  ;;  %v519_v30 = vadd.f32 %v503_v6, %v1151_v31 }
 0x140   : > { %524 = vst [vmem:[%s1215_s10 + $0x20] sm:$0xff] %v508_v10  ;;  %532 = vst [vmem:[%s1215_s10 + $0x60] sm:$0xff] %v516_v12  ;;  %v509_v7 = vadd.f32 %v493_v53, %v1087_v8  ;;  %v517_v25 = vadd.f32 %v501_v61, %v1137_v26 }
 0x141   : > { %527 = vst [vmem:[%s1215_s10 + $0x38] sm:$0xff] %v511_v9  ;;  %535 = vst [vmem:[%s1215_s10 + $0x78] sm:$0xff] %v519_v30 }
 0x142   : > { %525 = vst [vmem:[%s1215_s10 + $0x28] sm:$0xff] %v509_v7  ;;  %533 = vst [vmem:[%s1215_s10 + $0x68] sm:$0xff] %v517_v25 }
 0x143   : > { %845 = shalt.err (!%p842_p5)
}
 0x144   : > { %s846_s7 = scalar_lea.hbm %s1245_s23, 2048  ;;  %s850_s6 = scalar_lea.hbm %s1307_s3, 4096 }
 0x145   : > { %p847_p4 = scmp.ne.s32.totalorder %s1245_s23, %s846_s7  ;;  %p851_p12 = scmp.lt.u32.totalorder %s1245_s23, %s1307_s3 }
 0x146   : > { %p852_p1 = scmp.lt.u32.totalorder %s850_s6, %s846_s7  ;;  %p854_p8 = scmp.lt.u32.totalorder %s846_s7, %s1245_s23 }
 0x147   : > { %p848_p7 = pnand %p847_p4, %p1315_p9 }
 0x148   : > { %p853_p3 = por %p852_p1, %p851_p12 }
 0x149   : > { %p849_p10 = pneg %p848_p7 }
 0x14a   : > { %p855_p11 = por %p854_p8, %p853_p3 }
 0x14c   : > { %p856_p0 = pnand %p855_p11, %p849_p10 }
 0x14e   : > { %859 = shalt.err (!%p856_p0)
}
 0x14f   : > { %s921_s10 = smov 128   ;;  %s922_s18 = smov 8  }
 0x150   : > { %727 = dma.vmem_to_hbm [thread:$0]  (%p1315_p9), %s1247_s22, 2048, %s1245_s23, %s537_s28, %s921_s10, %s921_s10, %s922_s18  }
 0x151 PF: > { %s566_s15 = sand.u32 1, %s894_s12   ;;  %p1316_p6 = scmp.ne.s32.totalorder %s1312_s27, 0 }
 0x152   : > { %p1317_p13 = scmp.ge.s32.totalorder %s914_s17, 2  ;;  %s567_s21 = scalar_lea.sflag [#allocation4], %s566_s15 }
 0x154   : > { %p734_p2 = pnand %p1317_p13, %p1316_p6 }
 0x156   : > { %889 = dma.done.wait (!%p734_p2), %s567_s21, 2048  }
 0x157   : > { %891 = vsyncadd (!%p734_p2), %s567_s21, 4294965248  ;;  %s19_s17 = sadd.s32 1, %s914_s17   ;;  %s1318_s12 = smov %s898_s13 }
 0x158   : > { %p16_p5 = scmp.ge.s32.totalorder %s19_s17, 4   ;;  %s1319_s13 = smov %s902_s14 }
 0x159   : > { %s1320_s14 = smov %s999_s26  ;;  %s1321_s15 = smov %s910_s16 }
 0x15a   : > { %s1322_s16 = smov %s1324_s20  ;;  %18 = sbr.rel (!%p16_p5) target bundleno = 6 (0x6), region = 77 }
 0x161   :  { %572 = vsyncpa [#allocation3], 1 }
 0x162   :  { %574 = vsyncpa [#allocation3 + $0x1], 1 }
 0x163   :  { %575 = vsyncpa [#allocation4], 1 }
 0x164   :  { %577 = vsyncpa [#allocation4 + $0x1], 1 }

</bundles_post_ra>
